<compile_context>
chip_gen: v7x
topology: tpu7x:2x2x1
jax: 0.10.0
libtpu: 0.0.40
codegen_flags: <defaults>
</compile_context>

<pallas_src>
import jax
import jax.numpy as jnp
from jax.experimental import pallas as pl
from jax.experimental.pallas import tpu as pltpu


# ----------------------------------------------------------------------------
# Fused attention-pooling kernel (one batch tile per grid step)
# ----------------------------------------------------------------------------
def _attention_kernel(x_ref, w_ref, len_ref, rep_ref, att_ref):
    # x_ref:   (TB, Tp, Dp) f32  zero-padded inputs (T, D padded to 128)
    # w_ref:   (TB, 1,  Dp) f32  att_weights broadcast over the batch tile
    # len_ref: (TB, 1,  1)  i32  per-row valid lengths
    # rep_ref: (TB, 1,  Dp) f32  weighted representations   (lane-dense)
    # att_ref: (TB, 1,  Tp) f32  renormalised attentions    (lane-dense)
    x = x_ref[...]
    tb, tp, dp = x.shape

    # scores = bmm(inputs, att_weights^T)  -> MXU batched matmul (q = 1)
    s = jnp.einsum("bqd,btd->bqt", w_ref[...], x,
                   preferred_element_type=jnp.float32)          # (TB, 1, Tp)
    r = jnp.maximum(s, 0.0)                                     # relu
    p = jax.nn.softmax(r, axis=-1)                              # softmax over T

    # length mask built in-kernel (mask[i, t] = t < lengths[i])
    t_idx = jax.lax.broadcasted_iota(jnp.int32, (tb, 1, tp), 2)
    mask = (t_idx < len_ref[...]).astype(jnp.float32)

    masked = p * mask
    denom = jnp.sum(masked, axis=-1, keepdims=True)             # > 0 when length >= 1
    att = masked / denom                                        # renormalise (torch.div)

    # weighted = inputs * att ; representations = weighted.sum(T)  -> MXU matmul
    rep = jnp.einsum("bqt,btd->bqd", att, x,
                     preferred_element_type=jnp.float32)        # (TB, 1, Dp)

    rep_ref[...] = rep
    att_ref[...] = att


# ----------------------------------------------------------------------------
# Wrapper: pad to lane/sublane-friendly shapes, tile over batch, unpad outputs
# ----------------------------------------------------------------------------
def attention_forward(inputs, lengths, att_weights, *, batch_tile=8):
    """Pallas TPU implementation of Attention.forward (batch_first=True).

    inputs:      (B, T, D) float32
    lengths:     (B,)      int   (all >= 1)
    att_weights: (1, D)    float32
    Returns (representations (B, D), attentions (B, T)).
    """
    B, T, D = inputs.shape
    TB = batch_tile
    Bp = ((B + TB - 1) // TB) * TB
    Tp = ((T + 127) // 128) * 128
    Dp = ((D + 127) // 128) * 128

    x_pad = jnp.zeros((Bp, Tp, Dp), jnp.float32)
    x_pad = x_pad.at[:B, :T, :D].set(inputs.astype(jnp.float32))

    w_pad = jnp.zeros((1, 1, Dp), jnp.float32)
    w_pad = w_pad.at[0, 0, :D].set(att_weights.astype(jnp.float32)[0])
    w_b = jnp.broadcast_to(w_pad, (TB, 1, Dp))

    # padded batch rows get length 1 so their renormalisation stays finite
    len_pad = jnp.ones((Bp,), jnp.int32).at[:B].set(lengths.astype(jnp.int32))
    len_pad = len_pad.reshape(Bp, 1, 1)

    grid = (Bp // TB,)
    rep_pad, att_pad = pl.pallas_call(
        _attention_kernel,
        out_shape=(
            jax.ShapeDtypeStruct((Bp, 1, Dp), jnp.float32),
            jax.ShapeDtypeStruct((Bp, 1, Tp), jnp.float32),
        ),
        grid=grid,
        in_specs=[
            pl.BlockSpec((TB, Tp, Dp), lambda i: (i, 0, 0)),
            pl.BlockSpec((TB, 1, Dp), lambda i: (0, 0, 0)),
            pl.BlockSpec((TB, 1, 1), lambda i: (i, 0, 0)),
        ],
        out_specs=[
            pl.BlockSpec((TB, 1, Dp), lambda i: (i, 0, 0)),
            pl.BlockSpec((TB, 1, Tp), lambda i: (i, 0, 0)),
        ],
        compiler_params=pltpu.CompilerParams(
            dimension_semantics=("parallel",),
        ),
    )(x_pad, w_b, len_pad)

    representations = rep_pad[:B, 0, :D]
    attentions = att_pad[:B, 0, :T]
    return representations, attentions


# ----------------------------------------------------------------------------
# Pure-JAX reference (mirrors the PyTorch module) for validation
# ----------------------------------------------------------------------------
def _attention_reference(inputs, lengths, att_weights):
    B, T, D = inputs.shape
    s = jnp.einsum("btd,d->bt", inputs, att_weights[0])
    p = jax.nn.softmax(jnp.maximum(s, 0.0), axis=-1)
    mask = (jnp.arange(T)[None, :] < lengths[:, None]).astype(jnp.float32)
    masked = p * mask
    att = masked / jnp.sum(masked, axis=-1, keepdims=True)
    rep = jnp.einsum("bt,btd->bd", att, inputs)
    return rep, att


if __name__ == "__main__":
    B, T, D = 4, 8, 32  # batch, max_len, hidden_size

    key = jax.random.PRNGKey(0)
    k_x, k_w = jax.random.split(key)
    inputs = jax.random.normal(k_x, (B, T, D), jnp.float32)
    stdv = 1.0 / (D ** 0.5)
    att_weights = jax.random.uniform(k_w, (1, D), jnp.float32, minval=-stdv, maxval=stdv)
    lengths = jnp.array([8, 5, 8, 3], dtype=jnp.int32)  # all >= 1, max == T

    rep, att = jax.jit(attention_forward)(inputs, lengths, att_weights)
    rep = jax.block_until_ready(rep)
    att = jax.block_until_ready(att)

    rep_ref, att_ref = _attention_reference(inputs, lengths, att_weights)

    assert rep.shape == (B, D) and rep.dtype == jnp.float32
    assert att.shape == (B, T) and att.dtype == jnp.float32
    assert jnp.allclose(att.sum(-1), 1.0, atol=1e-3)
    assert bool(jnp.allclose(rep, rep_ref, rtol=2e-2, atol=2e-2))
    assert bool(jnp.allclose(att, att_ref, rtol=2e-2, atol=2e-2))
    print("KERNEL_OK")
</pallas_src>

<mosaic_0001>
module attributes {stable_mosaic.version = 11 : i64} {
  func.func @_attention_kernel(%arg0: i32, %arg1: memref<8x128x128xf32, #tpu.memory_space<vmem>>, %arg2: memref<8x1x128xf32, #tpu.memory_space<vmem>>, %arg3: memref<8x1x1xi32, #tpu.memory_space<vmem>>, %arg4: memref<8x1x128xf32, #tpu.memory_space<vmem>>, %arg5: memref<8x1x128xf32, #tpu.memory_space<vmem>>) attributes {dimension_semantics = [#tpu.dimension_semantics<parallel>], iteration_bounds = array<i64: 1>, scalar_prefetch = 0 : i64, scratch_operands = 0 : i64, tpu.core_type = #tpu.core_type<tc>, window_params = [{transform_indices = @transform_0, window_bounds = array<i64: 8, 128, 128>}, {pipeline_mode = #tpu.pipeline_mode<synchronous>, transform_indices = @transform_1, window_bounds = array<i64: 8, 1, 128>}, {transform_indices = @transform_2, window_bounds = array<i64: 8, 1, 1>}, {transform_indices = @transform_3, window_bounds = array<i64: 8, 1, 128>}, {transform_indices = @transform_4, window_bounds = array<i64: 8, 1, 128>}]} {
    %c0 = arith.constant 0 : index
    %c0_0 = arith.constant 0 : index
    %c0_1 = arith.constant 0 : index
    %0 = vector.load %arg1[%c0, %c0_0, %c0_1] : memref<8x128x128xf32, #tpu.memory_space<vmem>>, vector<8x128x128xf32>
    %c0_2 = arith.constant 0 : index
    %c0_3 = arith.constant 0 : index
    %c0_4 = arith.constant 0 : index
    %1 = vector.load %arg2[%c0_2, %c0_3, %c0_4] : memref<8x1x128xf32, #tpu.memory_space<vmem>>, vector<8x1x128xf32>
    "tpu.trace_start"() <{level = 10 : i32, message = "bqd,btd->bqt"}> : () -> ()
    %cst = arith.constant dense<0.000000e+00> : vector<8x1x128xf32>
    %2 = tpu.matmul %1, %0, %cst {dimension_numbers = #tpu.dot_dimension_numbers<[2], [2], [1], [1], [0, 0, 0, 1, 1, 1], [0], [0]>} : vector<8x1x128xf32>, vector<8x128x128xf32>, vector<8x1x128xf32> -> vector<8x1x128xf32>
    "tpu.trace_stop"() : () -> ()
    %cst_5 = arith.constant 0.000000e+00 : f32
    %3 = vector.broadcast %cst_5 : f32 to vector<8x1x128xf32>
    %4 = arith.maximumf %2, %3 : vector<8x1x128xf32>
    %cst_6 = arith.constant dense<0xFF800000> : vector<8x1xf32>
    %5 = vector.multi_reduction <maximumf>, %4, %cst_6 [2] : vector<8x1x128xf32> to vector<8x1xf32>
    %cst_7 = arith.constant 0xFF800000 : f32
    %6 = vector.broadcast %cst_7 : f32 to vector<8x1xf32>
    %7 = arith.maximumf %6, %5 : vector<8x1xf32>
    %8 = vector.shape_cast %7 : vector<8x1xf32> to vector<8x1x1xf32>
    %9 = vector.broadcast %8 : vector<8x1x1xf32> to vector<8x1x128xf32>
    %10 = arith.subf %4, %9 : vector<8x1x128xf32>
    %11 = math.exp %10 : vector<8x1x128xf32>
    %cst_8 = arith.constant dense<0.000000e+00> : vector<8x1xf32>
    %12 = vector.multi_reduction <add>, %11, %cst_8 [2] : vector<8x1x128xf32> to vector<8x1xf32>
    %13 = vector.shape_cast %12 : vector<8x1xf32> to vector<8x1x1xf32>
    %14 = vector.broadcast %13 : vector<8x1x1xf32> to vector<8x1x128xf32>
    %15 = arith.divf %11, %14 : vector<8x1x128xf32>
    %16 = tpu.iota {dimensions = array<i32: 2>} : vector<8x1x128xi32>
    %c0_9 = arith.constant 0 : index
    %c0_10 = arith.constant 0 : index
    %c0_11 = arith.constant 0 : index
    %17 = vector.load %arg3[%c0_9, %c0_10, %c0_11] : memref<8x1x1xi32, #tpu.memory_space<vmem>>, vector<8x1x1xi32>
    %18 = vector.broadcast %17 : vector<8x1x1xi32> to vector<8x1x128xi32>
    %19 = arith.cmpi slt, %16, %18 : vector<8x1x128xi32>
    %20 = arith.extui %19 : vector<8x1x128xi1> to vector<8x1x128xi32>
    %21 = arith.sitofp %20 : vector<8x1x128xi32> to vector<8x1x128xf32>
    %22 = arith.mulf %15, %21 : vector<8x1x128xf32>
    %cst_12 = arith.constant dense<0.000000e+00> : vector<8x1xf32>
    %23 = vector.multi_reduction <add>, %22, %cst_12 [2] : vector<8x1x128xf32> to vector<8x1xf32>
    %24 = vector.shape_cast %23 : vector<8x1xf32> to vector<8x1x1xf32>
    %25 = vector.broadcast %24 : vector<8x1x1xf32> to vector<8x1x128xf32>
    %26 = arith.divf %22, %25 : vector<8x1x128xf32>
    "tpu.trace_start"() <{level = 10 : i32, message = "bqt,btd->bqd"}> : () -> ()
    %cst_13 = arith.constant dense<0.000000e+00> : vector<8x1x128xf32>
    %27 = tpu.matmul %26, %0, %cst_13 {dimension_numbers = #tpu.dot_dimension_numbers<[2], [1], [1], [2], [0, 0, 0, 1, 1, 2], [0], [0]>} : vector<8x1x128xf32>, vector<8x128x128xf32>, vector<8x1x128xf32> -> vector<8x1x128xf32>
    "tpu.trace_stop"() : () -> ()
    %c0_14 = arith.constant 0 : index
    %c0_15 = arith.constant 0 : index
    %c0_16 = arith.constant 0 : index
    %28 = vector.load %arg4[%c0_14, %c0_15, %c0_16] : memref<8x1x128xf32, #tpu.memory_space<vmem>>, vector<8x1x128xf32>
    tpu.vector_store %arg4[%c0_14, %c0_15, %c0_16], %27 {strides = array<i32>} : memref<8x1x128xf32, #tpu.memory_space<vmem>>, vector<8x1x128xf32>,
    %c0_17 = arith.constant 0 : index
    %c0_18 = arith.constant 0 : index
    %c0_19 = arith.constant 0 : index
    %29 = vector.load %arg5[%c0_17, %c0_18, %c0_19] : memref<8x1x128xf32, #tpu.memory_space<vmem>>, vector<8x1x128xf32>
    tpu.vector_store %arg5[%c0_17, %c0_18, %c0_19], %26 {strides = array<i32>} : memref<8x1x128xf32, #tpu.memory_space<vmem>>, vector<8x1x128xf32>,
    return
  }
  func.func @transform_0(%arg0: i32) -> (i32, i32, i32) {
    %c0_i32 = arith.constant 0 : i32
    %c0_i32_0 = arith.constant 0 : i32
    %c0_i32_1 = arith.constant 0 : i32
    return %arg0, %c0_i32, %c0_i32_0 : i32, i32, i32
  }
  func.func @transform_1(%arg0: i32) -> (i32, i32, i32) {
    %c0_i32 = arith.constant 0 : i32
    %c0_i32_0 = arith.constant 0 : i32
    %c0_i32_1 = arith.constant 0 : i32
    %c0_i32_2 = arith.constant 0 : i32
    return %c0_i32, %c0_i32_0, %c0_i32_1 : i32, i32, i32
  }
  func.func @transform_2(%arg0: i32) -> (i32, i32, i32) {
    %c0_i32 = arith.constant 0 : i32
    %c0_i32_0 = arith.constant 0 : i32
    %c0_i32_1 = arith.constant 0 : i32
    return %arg0, %c0_i32, %c0_i32_0 : i32, i32, i32
  }
  func.func @transform_3(%arg0: i32) -> (i32, i32, i32) {
    %c0_i32 = arith.constant 0 : i32
    %c0_i32_0 = arith.constant 0 : i32
    %c0_i32_1 = arith.constant 0 : i32
    return %arg0, %c0_i32, %c0_i32_0 : i32, i32, i32
  }
  func.func @transform_4(%arg0: i32) -> (i32, i32, i32) {
    %c0_i32 = arith.constant 0 : i32
    %c0_i32_0 = arith.constant 0 : i32
    %c0_i32_1 = arith.constant 0 : i32
    return %arg0, %c0_i32, %c0_i32_0 : i32, i32, i32
  }
}

</mosaic_0001>

<bundles_post_ra>
// kernel: attention_forward.1
= control target key start
LH: loop header
LB: loop body
LE: loop exit
PB: predicated region body
PF: predicated region fallthrough
CT: control target
= control target key end

     0   :  { %v3878_v0 = vmov 0.0|0.0   ;;  %vm2810_vm0 = vmmov 0   ;;  %v3869_v6 = vmov 0.0   ;;  %vm720_vm1 = vcmask 1040384   ;;  %s3864_s0 = inlined_call_operand.vmem [shape: f32[8,128,128], index: 0, kind: input, shape index: {}]   ;;  %s3865_s1 = inlined_call_operand.vmem [shape: f32[8,1,128], index: 1, kind: input, shape index: {}]   ;;  %s3866_s2 = inlined_call_operand.vmem [shape: s32[8,1,1], index: 2, kind: input, shape index: {}]   ;;  %s3867_s4 = inlined_call_operand.vmem [shape: f32[8,1,128], index: 4, kind: output, shape index: {1}]   ;;  %s3868_s3 = inlined_call_operand.vmem [shape: f32[8,1,128], index: 3, kind: output, shape index: {0}]  }
   0x1   :  { %2371 = vmatprep.subr.bf16.mxu0 %v3878_v0  ;;  %2395 = vmatprep.subr.bf16.mxu1 %v3878_v0  ;;  %v16_v1 = vld [vmem:[%s3864_s0] sm:$0xff]  ;;  %v17_v2 = vld [vmem:[%s3864_s0 + $0x8] sm:$0xff]  ;;  %v18_v8 = vld [vmem:[%s3864_s0 + $0x10] sm:$0xff] }
   0x2   :  { %v32_v3 = vld [vmem:[%s3864_s0 + $0x80] sm:$0xff]  ;;  %v2849_v4 = vpack.c.bf16 %v17_v2, %v16_v1  ;;  %v33_v5 = vld [vmem:[%s3864_s0 + $0x88] sm:$0xff]  ;;  %1843 = vmatprep.mubr.msk.f32.mxu0 %vm2810_vm0, %v3869_v6  ;;  %1878 = vmatprep.mubr.msk.f32.mxu1 %vm2810_vm0, %v3869_v6  ;;  %v19_v9 = vld [vmem:[%s3864_s0 + $0x18] sm:$0xff] }
   0x3   :  { %v2858_v7 = vpack.c.bf16 %v33_v5, %v32_v3  ;;  %v34_v10 = vld [vmem:[%s3864_s0 + $0x90] sm:$0xff]  ;;  %v35_v11 = vld [vmem:[%s3864_s0 + $0x98] sm:$0xff]  ;;  %v2876_v12 = vpack.c.bf16 %v19_v9, %v18_v8  ;;  %v20_v14 = vld [vmem:[%s3864_s0 + $0x20] sm:$0xff] }
   0x4   :  { %2373 = vmatpush3.bf16.xpose.msra.mxu0 %v2849_v4  ;;  %v2878_v13 = vpack.c.bf16 %v35_v11, %v34_v10  ;;  %v21_v15 = vld [vmem:[%s3864_s0 + $0x28] sm:$0xff]  ;;  %v36_v16 = vld [vmem:[%s3864_s0 + $0xa0] sm:$0xff]  ;;  %v22_v20 = vld [vmem:[%s3864_s0 + $0x30] sm:$0xff] }
   0x5   :  { %2397 = vmatpush3.bf16.xpose.msra.mxu1 %v2858_v7  ;;  %2374 = vmatprep.subr.bf16.mxu0 %v3878_v0  ;;  %v37_v17 = vld [vmem:[%s3864_s0 + $0xa8] sm:$0xff]  ;;  %v2896_v18 = vpack.c.bf16 %v21_v15, %v20_v14  ;;  %v23_v21 = vld [vmem:[%s3864_s0 + $0x38] sm:$0xff]  ;;  %v38_v22 = vld [vmem:[%s3864_s0 + $0xb0] sm:$0xff] }
   0x6   :  { %2398 = vmatprep.subr.bf16.mxu1 %v3878_v0  ;;  %v2898_v19 = vpack.c.bf16 %v37_v17, %v36_v16  ;;  %v39_v23 = vld [vmem:[%s3864_s0 + $0xb8] sm:$0xff]  ;;  %v2916_v24 = vpack.c.bf16 %v23_v21, %v22_v20  ;;  %v24_v26 = vld [vmem:[%s3864_s0 + $0x40] sm:$0xff]  ;;  %v25_v27 = vld [vmem:[%s3864_s0 + $0x48] sm:$0xff] }
   0x7   :  { %v2918_v25 = vpack.c.bf16 %v39_v23, %v38_v22  ;;  %v40_v28 = vld [vmem:[%s3864_s0 + $0xc0] sm:$0xff]  ;;  %v41_v29 = vld [vmem:[%s3864_s0 + $0xc8] sm:$0xff]  ;;  %v2936_v30 = vpack.c.bf16 %v25_v27, %v24_v26  ;;  %v26_v32 = vld [vmem:[%s3864_s0 + $0x50] sm:$0xff] }
   0x8   :  { %v2938_v31 = vpack.c.bf16 %v41_v29, %v40_v28  ;;  %v27_v33 = vld [vmem:[%s3864_s0 + $0x58] sm:$0xff]  ;;  %v42_v34 = vld [vmem:[%s3864_s0 + $0xd0] sm:$0xff]  ;;  %v28_v38 = vld [vmem:[%s3864_s0 + $0x60] sm:$0xff] }
   0x9   :  { %v43_v35 = vld [vmem:[%s3864_s0 + $0xd8] sm:$0xff]  ;;  %v2956_v36 = vpack.c.bf16 %v27_v33, %v26_v32  ;;  %v29_v39 = vld [vmem:[%s3864_s0 + $0x68] sm:$0xff]  ;;  %v44_v40 = vld [vmem:[%s3864_s0 + $0xe0] sm:$0xff] }
   0xa   :  { %v2958_v37 = vpack.c.bf16 %v43_v35, %v42_v34  ;;  %v45_v41 = vld [vmem:[%s3864_s0 + $0xe8] sm:$0xff]  ;;  %v2976_v42 = vpack.c.bf16 %v29_v39, %v28_v38  ;;  %v30_v44 = vld [vmem:[%s3864_s0 + $0x70] sm:$0xff]  ;;  %v31_v45 = vld [vmem:[%s3864_s0 + $0x78] sm:$0xff] }
   0xb   :  { %v2978_v43 = vpack.c.bf16 %v45_v41, %v44_v40  ;;  %v46_v46 = vld [vmem:[%s3864_s0 + $0xf0] sm:$0xff]  ;;  %v47_v47 = vld [vmem:[%s3864_s0 + $0xf8] sm:$0xff]  ;;  %v2996_v48 = vpack.c.bf16 %v31_v45, %v30_v44  ;;  %v48_v50 = vld [vmem:[%s3864_s0 + $0x100] sm:$0xff] }
   0xc   :  { %2376 = vmatpush3.bf16.xpose.msra.mxu0 %v2876_v12  ;;  %v2998_v49 = vpack.c.bf16 %v47_v47, %v46_v46  ;;  %v49_v51 = vld [vmem:[%s3864_s0 + $0x108] sm:$0xff]  ;;  %v64_v52 = vld [vmem:[%s3864_s0 + $0x180] sm:$0xff]  ;;  %v50_v58 = vld [vmem:[%s3864_s0 + $0x110] sm:$0xff] }
   0xd   :  { %2400 = vmatpush3.bf16.xpose.msra.mxu1 %v2878_v13  ;;  %2377 = vmatprep.subr.bf16.mxu0 %v3878_v0  ;;  %v65_v53 = vld [vmem:[%s3864_s0 + $0x188] sm:$0xff]  ;;  %v144_v54 = vld [vmem:[%s3865_s1] sm:$0x1]  ;;  %v3019_v55 = vpack.c.bf16 %v49_v51, %v48_v50  ;;  %v145_v56 = vld [vmem:[%s3865_s1 + $0x1] sm:$0x1] }
   0xe   :  { %2401 = vmatprep.subr.bf16.mxu1 %v3878_v0  ;;  %v3024_v57 = vpack.c.bf16 %v65_v53, %v64_v52  ;;  %v51_v59 = vld [vmem:[%s3864_s0 + $0x118] sm:$0xff]  ;;  %v66_v60 = vld [vmem:[%s3864_s0 + $0x190] sm:$0xff]  ;;  %v52_v1 = vld [vmem:[%s3864_s0 + $0x120] sm:$0xff] }
   0xf   :  { %v67_v61 = vld [vmem:[%s3864_s0 + $0x198] sm:$0xff]  ;;  %v3046_v62 = vpack.c.bf16 %v51_v59, %v50_v58  ;;  %v53_v2 = vld [vmem:[%s3864_s0 + $0x128] sm:$0xff]  ;;  %v68_v3 = vld [vmem:[%s3864_s0 + $0x1a0] sm:$0xff] }
  0x10   :  { %v3048_v63 = vpack.c.bf16 %v67_v61, %v66_v60  ;;  %v69_v5 = vld [vmem:[%s3864_s0 + $0x1a8] sm:$0xff]  ;;  %v3066_v8 = vpack.c.bf16 %v53_v2, %v52_v1  ;;  %v54_v10 = vld [vmem:[%s3864_s0 + $0x130] sm:$0xff]  ;;  %v55_v11 = vld [vmem:[%s3864_s0 + $0x138] sm:$0xff] }
  0x11   :  { %v3068_v9 = vpack.c.bf16 %v69_v5, %v68_v3  ;;  %v70_v14 = vld [vmem:[%s3864_s0 + $0x1b0] sm:$0xff]  ;;  %v71_v15 = vld [vmem:[%s3864_s0 + $0x1b8] sm:$0xff]  ;;  %v3086_v16 = vpack.c.bf16 %v55_v11, %v54_v10  ;;  %v56_v20 = vld [vmem:[%s3864_s0 + $0x140] sm:$0xff] }
  0x12   :  { %v3088_v17 = vpack.c.bf16 %v71_v15, %v70_v14  ;;  %v57_v21 = vld [vmem:[%s3864_s0 + $0x148] sm:$0xff]  ;;  %v72_v22 = vld [vmem:[%s3864_s0 + $0x1c0] sm:$0xff]  ;;  %v58_v28 = vld [vmem:[%s3864_s0 + $0x150] sm:$0xff] }
  0x13   :  { %v73_v23 = vld [vmem:[%s3864_s0 + $0x1c8] sm:$0xff]  ;;  %v3106_v26 = vpack.c.bf16 %v57_v21, %v56_v20  ;;  %v59_v29 = vld [vmem:[%s3864_s0 + $0x158] sm:$0xff]  ;;  %v74_v32 = vld [vmem:[%s3864_s0 + $0x1d0] sm:$0xff] }
  0x14   :  { %2379 = vmatpush3.bf16.xpose.msra.mxu0 %v2896_v18  ;;  %v3108_v27 = vpack.c.bf16 %v73_v23, %v72_v22  ;;  %v75_v33 = vld [vmem:[%s3864_s0 + $0x1d8] sm:$0xff]  ;;  %v3126_v34 = vpack.c.bf16 %v59_v29, %v58_v28  ;;  %v60_v38 = vld [vmem:[%s3864_s0 + $0x160] sm:$0xff]  ;;  %v61_v39 = vld [vmem:[%s3864_s0 + $0x168] sm:$0xff] }
  0x15   :  { %2403 = vmatpush3.bf16.xpose.msra.mxu1 %v2898_v19  ;;  %2380 = vmatprep.subr.bf16.mxu0 %v3878_v0  ;;  %v3128_v35 = vpack.c.bf16 %v75_v33, %v74_v32  ;;  %v76_v40 = vld [vmem:[%s3864_s0 + $0x1e0] sm:$0xff]  ;;  %v77_v41 = vld [vmem:[%s3864_s0 + $0x1e8] sm:$0xff]  ;;  %v3146_v44 = vpack.c.bf16 %v61_v39, %v60_v38  ;;  %v62_v46 = vld [vmem:[%s3864_s0 + $0x170] sm:$0xff] }
  0x16   :  { %2404 = vmatprep.subr.bf16.mxu1 %v3878_v0  ;;  %v3148_v45 = vpack.c.bf16 %v77_v41, %v76_v40  ;;  %v63_v47 = vld [vmem:[%s3864_s0 + $0x178] sm:$0xff]  ;;  %v78_v50 = vld [vmem:[%s3864_s0 + $0x1f0] sm:$0xff]  ;;  %v96_v58 = vld [vmem:[%s3864_s0 + $0x280] sm:$0xff] }
  0x17   :  { %v79_v51 = vld [vmem:[%s3864_s0 + $0x1f8] sm:$0xff]  ;;  %v3166_v52 = vpack.c.bf16 %v63_v47, %v62_v46  ;;  %v97_v59 = vld [vmem:[%s3864_s0 + $0x288] sm:$0xff]  ;;  %v146_v60 = vld [vmem:[%s3865_s1 + $0x2] sm:$0x1] }
  0x18   :  { %v3168_v53 = vpack.c.bf16 %v79_v51, %v78_v50  ;;  %v147_v1 = vld [vmem:[%s3865_s1 + $0x3] sm:$0x1]  ;;  %v3194_v2 = vpack.c.bf16 %v97_v59, %v96_v58  ;;  %v82_v3 = vld [vmem:[%s3864_s0 + $0x210] sm:$0xff]  ;;  %v83_v5 = vld [vmem:[%s3864_s0 + $0x218] sm:$0xff] }
  0x19   :  { %v98_v10 = vld [vmem:[%s3864_s0 + $0x290] sm:$0xff]  ;;  %v99_v11 = vld [vmem:[%s3864_s0 + $0x298] sm:$0xff]  ;;  %v3216_v14 = vpack.c.bf16 %v83_v5, %v82_v3  ;;  %v84_v20 = vld [vmem:[%s3864_s0 + $0x220] sm:$0xff] }
  0x1a   :  { %v3218_v15 = vpack.c.bf16 %v99_v11, %v98_v10  ;;  %v85_v21 = vld [vmem:[%s3864_s0 + $0x228] sm:$0xff]  ;;  %v100_v22 = vld [vmem:[%s3864_s0 + $0x2a0] sm:$0xff]  ;;  %v86_v32 = vld [vmem:[%s3864_s0 + $0x230] sm:$0xff] }
  0x1b   :  { %v101_v23 = vld [vmem:[%s3864_s0 + $0x2a8] sm:$0xff]  ;;  %v3236_v28 = vpack.c.bf16 %v85_v21, %v84_v20  ;;  %v87_v33 = vld [vmem:[%s3864_s0 + $0x238] sm:$0xff]  ;;  %v102_v38 = vld [vmem:[%s3864_s0 + $0x2b0] sm:$0xff] }
  0x1c   :  { %2382 = vmatpush3.bf16.xpose.msra.mxu0 %v2916_v24  ;;  %v3238_v29 = vpack.c.bf16 %v101_v23, %v100_v22  ;;  %v103_v39 = vld [vmem:[%s3864_s0 + $0x2b8] sm:$0xff]  ;;  %v3256_v40 = vpack.c.bf16 %v87_v33, %v86_v32  ;;  %v88_v46 = vld [vmem:[%s3864_s0 + $0x240] sm:$0xff]  ;;  %v89_v47 = vld [vmem:[%s3864_s0 + $0x248] sm:$0xff] }
  0x1d   :  { %2406 = vmatpush3.bf16.xpose.msra.mxu1 %v2918_v25  ;;  %2383 = vmatprep.subr.bf16.mxu0 %v3878_v0  ;;  %v3258_v41 = vpack.c.bf16 %v103_v39, %v102_v38  ;;  %v104_v50 = vld [vmem:[%s3864_s0 + $0x2c0] sm:$0xff]  ;;  %v105_v51 = vld [vmem:[%s3864_s0 + $0x2c8] sm:$0xff]  ;;  %v3279_v58 = vpack.c.bf16 %v89_v47, %v88_v46  ;;  %v106_v3 = vld [vmem:[%s3864_s0 + $0x2d0] sm:$0xff] }
  0x1e   :  { %2407 = vmatprep.subr.bf16.mxu1 %v3878_v0  ;;  %v3281_v59 = vpack.c.bf16 %v105_v51, %v104_v50  ;;  %v107_v5 = vld [vmem:[%s3864_s0 + $0x2d8] sm:$0xff]  ;;  %v92_v20 = vld [vmem:[%s3864_s0 + $0x260] sm:$0xff]  ;;  %v93_v21 = vld [vmem:[%s3864_s0 + $0x268] sm:$0xff] }
  0x1f   :  { %v3301_v11 = vpack.c.bf16 %v107_v5, %v106_v3  ;;  %v108_v22 = vld [vmem:[%s3864_s0 + $0x2e0] sm:$0xff]  ;;  %v109_v23 = vld [vmem:[%s3864_s0 + $0x2e8] sm:$0xff]  ;;  %v3319_v32 = vpack.c.bf16 %v93_v21, %v92_v20  ;;  %v94_v38 = vld [vmem:[%s3864_s0 + $0x270] sm:$0xff] }
  0x20   :  { %v3321_v33 = vpack.c.bf16 %v109_v23, %v108_v22  ;;  %v95_v39 = vld [vmem:[%s3864_s0 + $0x278] sm:$0xff]  ;;  %v110_v46 = vld [vmem:[%s3864_s0 + $0x2f0] sm:$0xff]  ;;  %v148_v3 = vld [vmem:[%s3865_s1 + $0x4] sm:$0x1] }
  0x21   :  { %v111_v47 = vld [vmem:[%s3864_s0 + $0x2f8] sm:$0xff]  ;;  %v3339_v50 = vpack.c.bf16 %v95_v39, %v94_v38  ;;  %v149_v20 = vld [vmem:[%s3865_s1 + $0x5] sm:$0x1]  ;;  %v114_v22 = vld [vmem:[%s3864_s0 + $0x310] sm:$0xff] }
  0x22   :  { %v3341_v51 = vpack.c.bf16 %v111_v47, %v110_v46  ;;  %v115_v23 = vld [vmem:[%s3864_s0 + $0x318] sm:$0xff]  ;;  %v130_v38 = vld [vmem:[%s3864_s0 + $0x390] sm:$0xff] }
  0x23   :  { %v131_v39 = vld [vmem:[%s3864_s0 + $0x398] sm:$0xff]  ;;  %v3389_v46 = vpack.c.bf16 %v115_v23, %v114_v22  ;;  %v118_v22 = vld [vmem:[%s3864_s0 + $0x330] sm:$0xff] }
  0x24   :  { %2385 = vmatpush3.bf16.xpose.msra.mxu0 %v2936_v30  ;;  %v3391_v47 = vpack.c.bf16 %v131_v39, %v130_v38  ;;  %v119_v23 = vld [vmem:[%s3864_s0 + $0x338] sm:$0xff]  ;;  %v134_v38 = vld [vmem:[%s3864_s0 + $0x3b0] sm:$0xff] }
  0x25   :  { %2409 = vmatpush3.bf16.xpose.msra.mxu1 %v2938_v31  ;;  %2386 = vmatprep.subr.bf16.mxu0 %v3878_v0  ;;  %v135_v39 = vld [vmem:[%s3864_s0 + $0x3b8] sm:$0xff] }
  0x26   :  { %2410 = vmatprep.subr.bf16.mxu1 %v3878_v0 }
  0x2c   :  { %2388 = vmatpush3.bf16.xpose.msra.mxu0 %v2956_v36 }
  0x2d   :  { %2412 = vmatpush3.bf16.xpose.msra.mxu1 %v2958_v37  ;;  %2389 = vmatprep.subr.bf16.mxu0 %v3878_v0 }
  0x2e   :  { %2413 = vmatprep.subr.bf16.mxu1 %v3878_v0 }
  0x34   :  { %2391 = vmatpush3.bf16.xpose.msra.mxu0 %v2976_v42 }
  0x35   :  { %2415 = vmatpush3.bf16.xpose.msra.mxu1 %v2978_v43  ;;  %2392 = vmatprep.subr.bf16.mxu0 %v3878_v0 }
  0x36   :  { %2416 = vmatprep.subr.bf16.mxu1 %v3878_v0 }
  0x3c   :  { %2394 = vmatpush3.bf16.xpose.msra.mxu0 %v2996_v48 }
  0x3d   :  { %2418 = vmatpush3.bf16.xpose.msra.mxu1 %v2998_v49  ;;  %2419 = vmatprep.subr.bf16.mxu0 %v3878_v0 }
  0x3e   :  { %2443 = vmatprep.subr.bf16.mxu1 %v3878_v0 }
  0x43   :  { %1844 = vmatmul.mubr.f32.vlgmr.msra.gmra.mrb[0].mxu0 %v144_v54  ;;  %v80_v54 = vld [vmem:[%s3864_s0 + $0x200] sm:$0xff] }
  0x44   :  { %1879 = vmatmul.mubr.f32.vlgmr.msra.gmra.mrb[0].mxu1 %v145_v56  ;;  %2421 = vmatpush3.bf16.xpose.msra.mxu0 %v3019_v55  ;;  %v81_v56 = vld [vmem:[%s3864_s0 + $0x208] sm:$0xff] }
  0x45   :  { %2445 = vmatpush3.bf16.xpose.msra.mxu1 %v3024_v57  ;;  %2422 = vmatprep.subr.bf16.mxu0 %v3878_v0  ;;  %v3189_v61 = vpack.c.bf16 %v81_v56, %v80_v54  ;;  %v2812_v54 = vmov 0   ;;  %v812_v56 = vld [vmem:[%s3866_s2 + $0x1] sm:$0x1] }
  0x46   :  { %2446 = vmatprep.subr.bf16.mxu1 %v3878_v0  ;;  %1913 = vmatprep.mubr.msk.f32.mxu0 %vm2810_vm0, %v3869_v6 }
  0x47   :  { %1948 = vmatprep.mubr.msk.f32.mxu1 %vm2810_vm0, %v3869_v6  ;;  %2760 = vset.pattern.permute.xlu1 %v2812_v54 }
  0x48   :  { %2759 = vset.pattern.permute.xlu0 %v2812_v54  ;;  %827 = vperm.xlu1 %2760, %v812_v56   ;;  %v112_v54 = vld [vmem:[%s3864_s0 + $0x300] sm:$0xff]  ;;  %v113_v56 = vld [vmem:[%s3864_s0 + $0x308] sm:$0xff] }
  0x49   :  { %v3362_v5 = vpack.c.bf16 %v113_v56, %v112_v54  ;;  %v116_v54 = vld [vmem:[%s3864_s0 + $0x320] sm:$0xff]  ;;  %v117_v56 = vld [vmem:[%s3864_s0 + $0x328] sm:$0xff] }
  0x4c   :  { %2424 = vmatpush3.bf16.xpose.msra.mxu0 %v3046_v62 }
  0x4d   :  { %2448 = vmatpush3.bf16.xpose.msra.mxu1 %v3048_v63  ;;  %2425 = vmatprep.subr.bf16.mxu0 %v3878_v0 }
  0x4e   :  { %2449 = vmatprep.subr.bf16.mxu1 %v3878_v0 }
  0x54   :  { %2427 = vmatpush3.bf16.xpose.msra.mxu0 %v3066_v8 }
  0x55   :  { %2451 = vmatpush3.bf16.xpose.msra.mxu1 %v3068_v9  ;;  %2428 = vmatprep.subr.bf16.mxu0 %v3878_v0 }
  0x56   :  { %2452 = vmatprep.subr.bf16.mxu1 %v3878_v0 }
  0x5c   :  { %2430 = vmatpush3.bf16.xpose.msra.mxu0 %v3086_v16 }
  0x5d   :  { %2454 = vmatpush3.bf16.xpose.msra.mxu1 %v3088_v17  ;;  %2431 = vmatprep.subr.bf16.mxu0 %v3878_v0 }
  0x5e   :  { %2455 = vmatprep.subr.bf16.mxu1 %v3878_v0 }
  0x64   :  { %2433 = vmatpush3.bf16.xpose.msra.mxu0 %v3106_v26 }
  0x65   :  { %2457 = vmatpush3.bf16.xpose.msra.mxu1 %v3108_v27  ;;  %2434 = vmatprep.subr.bf16.mxu0 %v3878_v0 }
  0x66   :  { %2458 = vmatprep.subr.bf16.mxu1 %v3878_v0 }
  0x6c   :  { %2436 = vmatpush3.bf16.xpose.msra.mxu0 %v3126_v34 }
  0x6d   :  { %2460 = vmatpush3.bf16.xpose.msra.mxu1 %v3128_v35  ;;  %2437 = vmatprep.subr.bf16.mxu0 %v3878_v0 }
  0x6e   :  { %2461 = vmatprep.subr.bf16.mxu1 %v3878_v0 }
  0x74   :  { %2439 = vmatpush3.bf16.xpose.msra.mxu0 %v3146_v44 }
  0x75   :  { %2463 = vmatpush3.bf16.xpose.msra.mxu1 %v3148_v45  ;;  %2440 = vmatprep.subr.bf16.mxu0 %v3878_v0 }
  0x76   :  { %2464 = vmatprep.subr.bf16.mxu1 %v3878_v0 }
  0x7c   :  { %2442 = vmatpush3.bf16.xpose.msra.mxu0 %v3166_v52 }
  0x7d   :  { %2466 = vmatpush3.bf16.xpose.msra.mxu1 %v3168_v53  ;;  %2467 = vmatprep.subr.bf16.mxu0 %v3878_v0 }
  0x7e   :  { %2491 = vmatprep.subr.bf16.mxu1 %v3878_v0 }
  0x83   :  { %1914 = vmatmul.mubr.f32.vlgmr.msra.gmra.mrb[2].mxu0 %v146_v60  ;;  %v90_v60 = vld [vmem:[%s3864_s0 + $0x250] sm:$0xff] }
  0x84   :  { %1949 = vmatmul.mubr.f32.vlgmr.msra.gmra.mrb[2].mxu1 %v147_v1  ;;  %2469 = vmatpush3.bf16.xpose.msra.mxu0 %v3189_v61  ;;  %v91_v1 = vld [vmem:[%s3864_s0 + $0x258] sm:$0xff] }
  0x85   :  { %2493 = vmatpush3.bf16.xpose.msra.mxu1 %v3194_v2  ;;  %2470 = vmatprep.subr.bf16.mxu0 %v3878_v0  ;;  %v3299_v10 = vpack.c.bf16 %v91_v1, %v90_v60  ;;  %v128_v60 = vld [vmem:[%s3864_s0 + $0x380] sm:$0xff]  ;;  %v129_v1 = vld [vmem:[%s3864_s0 + $0x388] sm:$0xff] }
  0x86   :  { %2494 = vmatprep.subr.bf16.mxu1 %v3878_v0  ;;  %1983 = vmatprep.mubr.msk.f32.mxu0 %vm2810_vm0, %v3869_v6  ;;  %v3367_v21 = vpack.c.bf16 %v129_v1, %v128_v60  ;;  %v132_v60 = vld [vmem:[%s3864_s0 + $0x3a0] sm:$0xff]  ;;  %v133_v1 = vld [vmem:[%s3864_s0 + $0x3a8] sm:$0xff] }
  0x87   :  { %2018 = vmatprep.mubr.msk.f32.mxu1 %vm2810_vm0, %v3869_v6 }
  0x8c   :  { %2472 = vmatpush3.bf16.xpose.msra.mxu0 %v3216_v14 }
  0x8d   :  { %2496 = vmatpush3.bf16.xpose.msra.mxu1 %v3218_v15  ;;  %2473 = vmatprep.subr.bf16.mxu0 %v3878_v0 }
  0x8e   :  { %2497 = vmatprep.subr.bf16.mxu1 %v3878_v0 }
  0x94   :  { %2475 = vmatpush3.bf16.xpose.msra.mxu0 %v3236_v28 }
  0x95   :  { %2499 = vmatpush3.bf16.xpose.msra.mxu1 %v3238_v29  ;;  %2476 = vmatprep.subr.bf16.mxu0 %v3878_v0 }
  0x96   :  { %2500 = vmatprep.subr.bf16.mxu1 %v3878_v0 }
  0x9c   :  { %2478 = vmatpush3.bf16.xpose.msra.mxu0 %v3256_v40 }
  0x9d   :  { %2502 = vmatpush3.bf16.xpose.msra.mxu1 %v3258_v41  ;;  %2479 = vmatprep.subr.bf16.mxu0 %v3878_v0 }
  0x9e   :  { %2503 = vmatprep.subr.bf16.mxu1 %v3878_v0 }
  0xa4   :  { %2481 = vmatpush3.bf16.xpose.msra.mxu0 %v3279_v58 }
  0xa5   :  { %2505 = vmatpush3.bf16.xpose.msra.mxu1 %v3281_v59  ;;  %2482 = vmatprep.subr.bf16.mxu0 %v3878_v0 }
  0xa6   :  { %2506 = vmatprep.subr.bf16.mxu1 %v3878_v0 }
  0xac   :  { %2484 = vmatpush3.bf16.xpose.msra.mxu0 %v3299_v10 }
  0xad   :  { %2508 = vmatpush3.bf16.xpose.msra.mxu1 %v3301_v11  ;;  %2485 = vmatprep.subr.bf16.mxu0 %v3878_v0 }
  0xae   :  { %2509 = vmatprep.subr.bf16.mxu1 %v3878_v0 }
  0xb4   :  { %2487 = vmatpush3.bf16.xpose.msra.mxu0 %v3319_v32 }
  0xb5   :  { %2511 = vmatpush3.bf16.xpose.msra.mxu1 %v3321_v33  ;;  %2488 = vmatprep.subr.bf16.mxu0 %v3878_v0 }
  0xb6   :  { %2512 = vmatprep.subr.bf16.mxu1 %v3878_v0 }
  0xbc   :  { %2490 = vmatpush3.bf16.xpose.msra.mxu0 %v3339_v50 }
  0xbd   :  { %2514 = vmatpush3.bf16.xpose.msra.mxu1 %v3341_v51  ;;  %2515 = vmatprep.subr.bf16.mxu0 %v3878_v0 }
  0xbe   :  { %2539 = vmatprep.subr.bf16.mxu1 %v3878_v0 }
  0xc3   :  { %1984 = vmatmul.mubr.f32.vlgmr.msra.gmra.mrb[4].mxu0 %v148_v3  ;;  %v3409_v3 = vpack.c.bf16 %v117_v56, %v116_v54  ;;  %v3429_v54 = vpack.c.bf16 %v119_v23, %v118_v22  ;;  %v3431_v56 = vpack.c.bf16 %v135_v39, %v134_v38  ;;  %v136_v22 = vld [vmem:[%s3864_s0 + $0x3c0] sm:$0xff]  ;;  %v137_v23 = vld [vmem:[%s3864_s0 + $0x3c8] sm:$0xff] }
  0xc4   :  { %2019 = vmatmul.mubr.f32.vlgmr.msra.gmra.mrb[4].mxu1 %v149_v20  ;;  %2517 = vmatpush3.bf16.xpose.msra.mxu0 %v3362_v5  ;;  %v3411_v20 = vpack.c.bf16 %v133_v1, %v132_v60  ;;  %v120_v60 = vld [vmem:[%s3864_s0 + $0x340] sm:$0xff]  ;;  %v121_v1 = vld [vmem:[%s3864_s0 + $0x348] sm:$0xff]  ;;  %v3451_v39 = vpack.c.bf16 %v137_v23, %v136_v22 }
  0xc5   :  { %2541 = vmatpush3.bf16.xpose.msra.mxu1 %v3367_v21  ;;  %2518 = vmatprep.subr.bf16.mxu0 %v3878_v0  ;;  %3885 = vst [vmem:[#allocation3_spill] sm:$0xff] %v3431_v56  ;;  %v3449_v38 = vpack.c.bf16 %v121_v1, %v120_v60  ;;  %v138_v60 = vld [vmem:[%s3864_s0 + $0x3d0] sm:$0xff]  ;;  %v139_v1 = vld [vmem:[%s3864_s0 + $0x3d8] sm:$0xff] }
  0xc6   :  { %2542 = vmatprep.subr.bf16.mxu1 %v3878_v0  ;;  %2053 = vmatprep.mubr.msk.f32.mxu0 %vm2810_vm0, %v3869_v6  ;;  %3884 = vst [vmem:[#allocation2_spill] sm:$0xff] %v3411_v20  ;;  %3886 = vst [vmem:[#allocation4_spill] sm:$0xff] %v3451_v39  ;;  %v3471_v23 = vpack.c.bf16 %v139_v1, %v138_v60 }
  0xc7   :  { %2088 = vmatprep.mubr.msk.f32.mxu1 %vm2810_vm0, %v3869_v6  ;;  %v122_v6 = vld [vmem:[%s3864_s0 + $0x350] sm:$0xff] }
  0xc8   :  { %3888 = vst [vmem:[#allocation6_spill] sm:$0xff] %v3471_v23 }
  0xcc   :  { %2520 = vmatpush3.bf16.xpose.msra.mxu0 %v3389_v46 }
  0xcd   :  { %2544 = vmatpush3.bf16.xpose.msra.mxu1 %v3391_v47  ;;  %2521 = vmatprep.subr.bf16.mxu0 %v3878_v0 }
  0xce   :  { %2545 = vmatprep.subr.bf16.mxu1 %v3878_v0 }
  0xd4   :  { %2523 = vmatpush3.bf16.xpose.msra.mxu0 %v3409_v3 }
  0xd5   :  { %2547 = vmatpush3.bf16.xpose.msra.mxu1 %v3411_v20  ;;  %2524 = vmatprep.subr.bf16.mxu0 %v3878_v0  ;;  %v125_v20 = vld [vmem:[%s3864_s0 + $0x368] sm:$0xff] }
  0xd6   :  { %2548 = vmatprep.subr.bf16.mxu1 %v3878_v0 }
  0xdc   :  { %2526 = vmatpush3.bf16.xpose.msra.mxu0 %v3429_v54 }
  0xdd   :  { %2550 = vmatpush3.bf16.xpose.msra.mxu1 %v3431_v56  ;;  %2527 = vmatprep.subr.bf16.mxu0 %v3878_v0  ;;  %v123_v56 = vld [vmem:[%s3864_s0 + $0x358] sm:$0xff] }
  0xde   :  { %2551 = vmatprep.subr.bf16.mxu1 %v3878_v0  ;;  %v3469_v22 = vpack.c.bf16 %v123_v56, %v122_v6  ;;  %v140_v6 = vld [vmem:[%s3864_s0 + $0x3e0] sm:$0xff]  ;;  %v141_v56 = vld [vmem:[%s3864_s0 + $0x3e8] sm:$0xff] }
  0xdf   :  { %v3491_v1 = vpack.c.bf16 %v141_v56, %v140_v6 }
  0xe0   :  { %3887 = vst [vmem:[#allocation5_spill] sm:$0xff] %v3469_v22 }
  0xe1   :  { %3890 = vst [vmem:[#allocation8_spill] sm:$0xff] %v3491_v1 }
  0xe4   :  { %2529 = vmatpush3.bf16.xpose.msra.mxu0 %v3449_v38 }
  0xe5   :  { %2553 = vmatpush3.bf16.xpose.msra.mxu1 %v3451_v39  ;;  %2530 = vmatprep.subr.bf16.mxu0 %v3878_v0  ;;  %v124_v39 = vld [vmem:[%s3864_s0 + $0x360] sm:$0xff] }
  0xe6   :  { %2554 = vmatprep.subr.bf16.mxu1 %v3878_v0  ;;  %v3489_v60 = vpack.c.bf16 %v125_v20, %v124_v39  ;;  %v142_v20 = vld [vmem:[%s3864_s0 + $0x3f0] sm:$0xff]  ;;  %v143_v39 = vld [vmem:[%s3864_s0 + $0x3f8] sm:$0xff] }
  0xe7   :  { %v3511_v56 = vpack.c.bf16 %v143_v39, %v142_v20 }
  0xe8   :  { %3889 = vst [vmem:[#allocation7_spill] sm:$0xff] %v3489_v60 }
  0xe9   :  { %3892 = vst [vmem:[#allocation10_spill] sm:$0xff] %v3511_v56 }
  0xec   :  { %2532 = vmatpush3.bf16.xpose.msra.mxu0 %v3469_v22  ;;  %v127_v22 = vld [vmem:[%s3864_s0 + $0x378] sm:$0xff] }
  0xed   :  { %2556 = vmatpush3.bf16.xpose.msra.mxu1 %v3471_v23  ;;  %2533 = vmatprep.subr.bf16.mxu0 %v3878_v0  ;;  %v126_v23 = vld [vmem:[%s3864_s0 + $0x370] sm:$0xff] }
  0xee   :  { %2557 = vmatprep.subr.bf16.mxu1 %v3878_v0  ;;  %v3509_v6 = vpack.c.bf16 %v127_v22, %v126_v23  ;;  %v3893_v22 = vmov 0.0  }
  0xf0   :  { %3891 = vst [vmem:[#allocation9_spill] sm:$0xff] %v3509_v6 }
  0xf4   :  { %2535 = vmatpush3.bf16.xpose.msra.mxu0 %v3489_v60  ;;  %v151_v60 = vld [vmem:[%s3865_s1 + $0x7] sm:$0x1] }
  0xf5   :  { %2559 = vmatpush3.bf16.xpose.msra.mxu1 %v3491_v1  ;;  %2536 = vmatprep.subr.bf16.mxu0 %v3878_v0  ;;  %v150_v1 = vld [vmem:[%s3865_s1 + $0x6] sm:$0x1] }
  0xf6   :  { %2560 = vmatprep.subr.bf16.mxu1 %v3878_v0 }
  0xfc   :  { %2538 = vmatpush3.bf16.xpose.msra.mxu0 %v3509_v6 }
  0xfd   :  { %2562 = vmatpush3.bf16.xpose.msra.mxu1 %v3511_v56  ;;  %2563 = vmatprep.subr.bf16.mxu0 %v3878_v0 }
  0xfe   :  { %2587 = vmatprep.subr.bf16.mxu1 %v3878_v0 }
 0x103   :  { %2054 = vmatmul.mubr.f32.vlgmr.msra.gmra.mrb[6].mxu0 %v150_v1 }
 0x104   :  { %2089 = vmatmul.mubr.f32.vlgmr.msra.gmra.mrb[6].mxu1 %v151_v60  ;;  %2565 = vmatpush3.bf16.msra.mxu0 %v2849_v4 }
 0x105   :  { %2566 = vmatprep.subr.bf16.mxu0 %v3878_v0  ;;  %2589 = vmatpush3.bf16.msra.mxu1 %v2858_v7 }
 0x106   :  { %2590 = vmatprep.subr.bf16.mxu1 %v3878_v0  ;;  %2123 = vmatprep.mubr.msk.f32.mxu0 %vm2810_vm0, %v3893_v22 }
 0x107   :  { %2158 = vmatprep.mubr.msk.f32.mxu1 %vm2810_vm0, %v3893_v22 }
 0x108   :  { %2568 = vmatpush3.bf16.msra.mxu0 %v2876_v12 }
 0x109   :  { %2569 = vmatprep.subr.bf16.mxu0 %v3878_v0  ;;  %2592 = vmatpush3.bf16.msra.mxu1 %v2878_v13 }
 0x10a   :  { %2593 = vmatprep.subr.bf16.mxu1 %v3878_v0 }
 0x10c   :  { %2571 = vmatpush3.bf16.msra.mxu0 %v2896_v18 }
 0x10d   :  { %2572 = vmatprep.subr.bf16.mxu0 %v3878_v0  ;;  %2595 = vmatpush3.bf16.msra.mxu1 %v2898_v19 }
 0x10e   :  { %2596 = vmatprep.subr.bf16.mxu1 %v3878_v0 }
 0x110   :  { %2574 = vmatpush3.bf16.msra.mxu0 %v2916_v24 }
 0x111   :  { %2575 = vmatprep.subr.bf16.mxu0 %v3878_v0  ;;  %2598 = vmatpush3.bf16.msra.mxu1 %v2918_v25 }
 0x112   :  { %2599 = vmatprep.subr.bf16.mxu1 %v3878_v0 }
 0x114   :  { %2577 = vmatpush3.bf16.msra.mxu0 %v2936_v30  ;;  %v811_v30 = vld [vmem:[%s3866_s2] sm:$0x1] }
 0x115   :  { %2578 = vmatprep.subr.bf16.mxu0 %v3878_v0  ;;  %2601 = vmatpush3.bf16.msra.mxu1 %v2938_v31 }
 0x116   :  { %v218_v4 = vpop.f32.mrb[0].mxu0  ;;  %2602 = vmatprep.subr.bf16.mxu1 %v3878_v0 }
 0x117   :  { %v712_v7 = vmax.f32 %v218_v4, 0.0  ;;  %v1845_v12 = vpop.f32.mrb[1].mxu0  ;;  %v288_v13 = vpop.f32.mrb[0].mxu1 }
 0x118   :  { %v713_v18 = vmax.f32 %v288_v13, 0.0  ;;  %v1880_v19 = vpop.f32.mrb[1].mxu1  ;;  %2580 = vmatpush3.bf16.msra.mxu0 %v2956_v36 }
 0x119   :  { %v721_v24 = vsel %vm720_vm1, %v712_v7, -inf  ;;  %2581 = vmatprep.subr.bf16.mxu0 %v3878_v0  ;;  %2604 = vmatpush3.bf16.msra.mxu1 %v2958_v37 }
 0x11a   :  { %722 = vmax.xlane.f32.xlu0 %v721_v24  ;;  %2605 = vmatprep.subr.bf16.mxu1 %v3878_v0  ;;  %v724_v25 = vsel %vm720_vm1, %v713_v18, -inf }
 0x11c   :  { %2583 = vmatpush3.bf16.msra.mxu0 %v2976_v42 }
 0x11d   :  { %2584 = vmatprep.subr.bf16.mxu0 %v3878_v0  ;;  %2607 = vmatpush3.bf16.msra.mxu1 %v2978_v43 }
 0x11e   :  { %725 = vmax.xlane.f32.xlu0 %v724_v25  ;;  %2608 = vmatprep.subr.bf16.mxu1 %v3878_v0 }
 0x120   :  { %2586 = vmatpush3.bf16.msra.mxu0 %v2996_v48 }
 0x121   :  { %2610 = vmatpush3.bf16.msra.mxu1 %v2998_v49  ;;  %2611 = vmatprep.subr.bf16.mxu0 %v3878_v0 }
 0x122   :  { %2635 = vmatprep.subr.bf16.mxu1 %v3878_v0 }
 0x134   :  { %820 = vperm.xlu0 %2759, %v811_v30   ;;  %v813_v30 = vld [vmem:[%s3866_s2 + $0x2] sm:$0x1] }
 0x156   :  { %v358_v31 = vpop.f32.mrb[2].mxu0 }
 0x157   :  { %v714_v36 = vmax.f32 %v358_v31, 0.0  ;;  %v1915_v37 = vpop.f32.mrb[3].mxu0  ;;  %v428_v42 = vpop.f32.mrb[2].mxu1 }
 0x158   :  { %v715_v43 = vmax.f32 %v428_v42, 0.0  ;;  %v1950_v23 = vpop.f32.mrb[3].mxu1 }
 0x159   :  { %v727_v60 = vsel %vm720_vm1, %v714_v36, -inf }
 0x15a   :  { %728 = vmax.xlane.f32.xlu1 %v727_v60  ;;  %v730_v48 = vsel %vm720_vm1, %v715_v43, -inf }
 0x15e   :  { %731 = vmax.xlane.f32.xlu1 %v730_v48 }
 0x196   :  { %v498_v49 = vpop.f32.mrb[4].mxu0 }
 0x197   :  { %v716_v1 = vmax.f32 %v498_v49, 0.0  ;;  %v568_v20 = vpop.f32.mrb[4].mxu1  ;;  %v1985_v39 = vpop.f32.mrb[5].mxu0 }
 0x198   :  { %v717_v4 = vmax.f32 %v568_v20, 0.0  ;;  %v2020_v12 = vpop.f32.mrb[5].mxu1 }
 0x199   :  { %v733_v13 = vsel %vm720_vm1, %v716_v1, -inf }
 0x19a   :  { %v736_v19 = vsel %vm720_vm1, %v717_v4, -inf  ;;  %734 = vmax.xlane.f32.xlu0 %v733_v13 }
 0x19b   :  { %737 = vmax.xlane.f32.xlu1 %v736_v19 }
 0x1a7   :  { %v723_v24 = vpop.xlane.xlu0 %722 }
 0x1a8   :  { %v745_v25 = vsub.f32 %v712_v7, %v723_v24 }
 0x1aa   :  { %v753_v31 = vmul.f32 1.442695, %v745_v25 }
 0x1ab   :  { %v726_v42 = vpop.xlane.xlu0 %725 }
 0x1ac   :  { %2761 = vpow2.f32 %v753_v31  ;;  %834 = vperm.xlu1 %2760, %v813_v30   ;;  %v746_v60 = vsub.f32 %v713_v18, %v726_v42  ;;  %v828_v30 = vpop.permute.xlu1 %827 }
 0x1ae   :  { %v755_v48 = vmul.f32 1.442695, %v746_v60  ;;  %v815_v60 = vld [vmem:[%s3866_s2 + $0x4] sm:$0x1] }
 0x1b0   :  { %2763 = vpow2.f32 %v755_v48 }
 0x1b6   :  { %v3571_v37 = vpop.eup %2761 }
 0x1b7   :  { %v769_v23 = vsel %vm720_vm1, %v3571_v37, 0.0 }
 0x1b8   :  { %770 = vadd.xlane.f32.xlu0 %v769_v23 }
 0x1ba   :  { %v3575_v49 = vpop.eup %2763 }
 0x1bb   :  { %v772_v7 = vsel %vm720_vm1, %v3575_v49, 0.0 }
 0x1d0   :  { %773 = vadd.xlane.f32.xlu1 %v772_v7 }
 0x1d6   :  { %v3579_v20 = vpop.f32.mrb[6].mxu0 }
 0x1d7   :  { %v3881_v39 = vmax.f32 %v3579_v20, 0.0  ;;  %v3582_v12 = vpop.f32.mrb[6].mxu1  ;;  %v2055_v13 = vpop.f32.mrb[7].mxu0 }
 0x1d8   :  { %v3880_v19 = vmax.f32 %v3582_v12, 0.0  ;;  %v2090_v24 = vpop.f32.mrb[7].mxu1 }
 0x1d9   :  { %v739_v18 = vsel %vm720_vm1, %v3881_v39, -inf }
 0x1da   :  { %v742_v25 = vsel %vm720_vm1, %v3880_v19, -inf  ;;  %740 = vmax.xlane.f32.xlu0 %v739_v18  ;;  %v809_v19 = vlaneseq }
 0x1db   :  { %743 = vmax.xlane.f32.xlu1 %v742_v25 }
 0x1e7   :  { %v729_v31 = vpop.xlane.xlu1 %728 }
 0x1e8   :  { %v747_v42 = vsub.f32 %v714_v36, %v729_v31  ;;  %v814_v36 = vld [vmem:[%s3866_s2 + $0x3] sm:$0x1] }
 0x1ea   :  { %v757_v23 = vmul.f32 1.442695, %v747_v42  ;;  %v816_v42 = vld [vmem:[%s3866_s2 + $0x5] sm:$0x1] }
 0x1eb   :  { %v732_v7 = vpop.xlane.xlu1 %731 }
 0x1ec   :  { %2765 = vpow2.f32 %v757_v23  ;;  %v748_v24 = vsub.f32 %v715_v43, %v732_v7  ;;  %v821_v23 = vpop.permute.xlu0 %820 }
 0x1ee   :  { %v759_v18 = vmul.f32 1.442695, %v748_v24 }
 0x1f0   :  { %848 = vperm.xlu0 %2759, %v815_v60   ;;  %2767 = vpow2.f32 %v759_v18 }
 0x1f6   :  { %v3594_v48 = vpop.eup %2765 }
 0x1f7   :  { %v775_v13 = vsel %vm720_vm1, %v3594_v48, 0.0 }
 0x1f8   :  { %776 = vadd.xlane.f32.xlu1 %v775_v13 }
 0x1fa   :  { %v3601_v25 = vpop.eup %2767 }
 0x1fb   :  { %v778_v31 = vsel %vm720_vm1, %v3601_v25, 0.0 }
 0x209   :  { %841 = vperm.xlu1 %2760, %v814_v36  }
 0x20f   :  { %779 = vadd.xlane.f32.xlu0 %v778_v31 }
 0x225   :  { %855 = vperm.xlu0 %2759, %v816_v42  }
 0x227   :  { %v735_v43 = vpop.xlane.xlu0 %734 }
 0x228   :  { %v749_v60 = vsub.f32 %v716_v1, %v735_v43  ;;  %v738_v13 = vpop.xlane.xlu1 %737  ;;  %v823_v1 = vshrl.u32 %v809_v19, 7 }
 0x229   :  { %v750_v24 = vsub.f32 %v717_v4, %v738_v13 }
 0x22a   :  { %v761_v7 = vmul.f32 1.442695, %v749_v60  ;;  %v3616_v60 = vsub.s32 0, %v823_v1 }
 0x22b   :  { %v763_v18 = vmul.f32 1.442695, %v750_v24 }
 0x22c   :  { %2769 = vpow2.f32 %v761_v7  ;;  %v825_v4 = vrot.slane %v821_v23, %v3616_v60  ;;  %v3619_v7 = vand.u32 127, %v809_v19  ;;  %v832_v23 = vrot.slane %v828_v30, %v3616_v60 }
 0x22d   :  { %2771 = vpow2.f32 %v763_v18 }
 0x22e   :  { %vm875_vm2 = vcmp.lt.s32.totalorder %v3619_v7, %v825_v4  ;;  %vm876_vm3 = vcmp.lt.s32.totalorder %v3619_v7, %v832_v23 }
 0x22f   :  { %v1531_v24 = vsel %vm875_vm2, 1.0, %v3893_v22  ;;  %v1532_v30 = vsel %vm876_vm3, 1.0, %v3893_v22 }
 0x236   :  { %v3608_v36 = vpop.eup %2769 }
 0x237   :  { %v781_v0 = vsel %vm720_vm1, %v3608_v36, 0.0  ;;  %v3612_v31 = vpop.eup %2771 }
 0x238   :  { %782 = vadd.xlane.f32.xlu1 %v781_v0  ;;  %v784_v42 = vsel %vm720_vm1, %v3612_v31, 0.0 }
 0x244   :  { %785 = vadd.xlane.f32.xlu0 %v784_v42 }
 0x245   :  { %v771_v43 = vpop.xlane.xlu0 %770 }
 0x246   :  { %2773 = vrcp.f32 %v771_v43  ;;  %v835_v43 = vpop.permute.xlu1 %834 }
 0x250   :  { %v2774_v13 = vpop.eup %2773 }
 0x251   :  { %v794_v0 = vmul.f32 %v2774_v13, %v3571_v37  ;;  %v3894_v37 = vmax.f32 %v3579_v20, 0.0 }
 0x253   :  { %v3624_v18 = vmul.f32 %v1531_v24, %v794_v0  ;;  %v3895_v0 = vmax.f32 %v3582_v12, 0.0 }
 0x255   :  { %v907_v42 = vsel %vm720_vm1, %v3624_v18, 0.0 }
 0x256   :  { %908 = vadd.xlane.f32.xlu0 %v907_v42  ;;  %v818_v42 = vld [vmem:[%s3866_s2 + $0x7] sm:$0x1] }
 0x25d   :  { %v774_v1 = vpop.xlane.xlu1 %773 }
 0x25e   :  { %2775 = vrcp.f32 %v774_v1 }
 0x267   :  { %v741_v19 = vpop.xlane.xlu0 %740 }
 0x268   :  { %v2776_v4 = vpop.eup %2775  ;;  %v744_v39 = vpop.xlane.xlu1 %743  ;;  %v751_v13 = vsub.f32 %v3894_v37, %v741_v19 }
 0x269   :  { %v752_v24 = vsub.f32 %v3895_v0, %v744_v39  ;;  %v796_v56 = vmul.f32 %v2776_v4, %v3575_v49 }
 0x26a   :  { %v765_v1 = vmul.f32 1.442695, %v751_v13 }
 0x26b   :  { %v767_v6 = vmul.f32 1.442695, %v752_v24  ;;  %v3639_v23 = vmul.f32 %v1532_v30, %v796_v56  ;;  %v817_v56 = vld [vmem:[%s3866_s2 + $0x6] sm:$0x1]  ;;  %v839_v24 = vrot.slane %v835_v43, %v3616_v60 }
 0x26c   :  { %2777 = vpow2.f32 %v765_v1  ;;  %869 = vperm.xlu0 %2759, %v818_v42  }
 0x26d   :  { %v910_v20 = vsel %vm720_vm1, %v3639_v23, 0.0  ;;  %2779 = vpow2.f32 %v767_v6  ;;  %vm877_vm5 = vcmp.lt.s32.totalorder %v3619_v7, %v839_v24 }
 0x26e   :  { %911 = vadd.xlane.f32.xlu1 %v910_v20 }
 0x26f   :  { %v849_v4 = vpop.permute.xlu0 %848 }
 0x276   :  { %v3643_v39 = vpop.eup %2777 }
 0x277   :  { %v787_v12 = vsel %vm720_vm1, %v3643_v39, 0.0  ;;  %v3647_v19 = vpop.eup %2779 }
 0x278   :  { %788 = vadd.xlane.f32.xlu1 %v787_v12  ;;  %v790_v49 = vsel %vm720_vm1, %v3647_v19, 0.0 }
 0x27c   :  { %791 = vadd.xlane.f32.xlu1 %v790_v49 }
 0x285   :  { %v777_v6 = vpop.xlane.xlu1 %776 }
 0x286   :  { %2781 = vrcp.f32 %v777_v6 }
 0x289   :  { %v842_v13 = vpop.permute.xlu1 %841 }
 0x28a   :  { %v846_v0 = vrot.slane %v842_v13, %v3616_v60 }
 0x28c   :  { %vm878_vm4 = vcmp.lt.s32.totalorder %v3619_v7, %v846_v0 }
 0x28d   :  { %862 = vperm.xlu1 %2760, %v817_v56   ;;  %v1534_v12 = vsel %vm878_vm4, 1.0, %v3893_v22  ;;  %v1533_v56 = vsel %vm877_vm5, 1.0, %v3893_v22 }
 0x290   :  { %v2782_v42 = vpop.eup %2781 }
 0x291   :  { %v798_v20 = vmul.f32 %v2782_v42, %v3594_v48  ;;  %v853_v48 = vrot.slane %v849_v4, %v3616_v60 }
 0x293   :  { %v3666_v43 = vmul.f32 %v1533_v56, %v798_v20  ;;  %vm879_vm6 = vcmp.lt.s32.totalorder %v3619_v7, %v853_v48 }
 0x29c   :  { %v780_v37 = vpop.xlane.xlu0 %779 }
 0x29d   :  { %2783 = vrcp.f32 %v780_v37  ;;  %v913_v37 = vsel %vm720_vm1, %v3666_v43, 0.0 }
 0x2a7   :  { %v2784_v1 = vpop.eup %2783 }
 0x2a8   :  { %v800_v30 = vmul.f32 %v2784_v1, %v3601_v25  ;;  %v856_v25 = vpop.permute.xlu0 %855  ;;  %v1535_v1 = vsel %vm879_vm6, 1.0, %v3893_v22 }
 0x2aa   :  { %v3661_v49 = vmul.f32 %v1534_v12, %v800_v30  ;;  %v860_v12 = vrot.slane %v856_v25, %v3616_v60 }
 0x2ac   :  { %v916_v6 = vsel %vm720_vm1, %v3661_v49, 0.0  ;;  %vm880_vm7 = vcmp.lt.s32.totalorder %v3619_v7, %v860_v12 }
 0x2ad   :  { %917 = vadd.xlane.f32.xlu0 %v916_v6  ;;  %v1536_v6 = vsel %vm880_vm7, 1.0, %v3893_v22 }
 0x2b1   :  { %914 = vadd.xlane.f32.xlu1 %v913_v37 }
 0x2c5   :  { %v783_v13 = vpop.xlane.xlu1 %782 }
 0x2c6   :  { %2785 = vrcp.f32 %v783_v13 }
 0x2d0   :  { %v2786_v0 = vpop.eup %2785 }
 0x2d1   :  { %v786_v24 = vpop.xlane.xlu0 %785  ;;  %v802_v42 = vmul.f32 %v2786_v0, %v3608_v36 }
 0x2d2   :  { %2787 = vrcp.f32 %v786_v24 }
 0x2d3   :  { %v3674_v30 = vmul.f32 %v1535_v1, %v802_v42 }
 0x2d5   :  { %v919_v20 = vsel %vm720_vm1, %v3674_v30, 0.0 }
 0x2d6   :  { %920 = vadd.xlane.f32.xlu1 %v919_v20 }
 0x2dc   :  { %v2788_v4 = vpop.eup %2787 }
 0x2dd   :  { %v804_v56 = vmul.f32 %v2788_v4, %v3612_v31  ;;  %v3896_v31 = vmov 0.0|0.0  }
 0x2df   :  { %v3682_v37 = vmul.f32 %v1536_v6, %v804_v56 }
 0x2e1   :  { %v922_v36 = vsel %vm720_vm1, %v3682_v37, 0.0 }
 0x2e2   :  { %923 = vadd.xlane.f32.xlu1 %v922_v36 }
 0x2e3   :  { %v909_v13 = vpop.xlane.xlu0 %908 }
 0x2e4   :  { %2789 = vrcp.f32 %v909_v13 }
 0x2ee   :  { %v2790_v48 = vpop.eup %2789 }
 0x2ef   :  { %v932_v0 = vmul.f32 %v2790_v48, %v3624_v18 }
 0x2f1   :  { %2124 = vmatmul.mubr.f32.vlgmr.msra.gmra.mrb[8].mxu0 %v932_v0  ;;  %1515 = vst [vmem:[%s3867_s4] sm:$0x1] %v932_v0 }
 0x2f2   :  { %2613 = vmatpush3.bf16.msra.mxu0 %v3019_v55  ;;  %2193 = vmatprep.mubr.msk.f32.mxu0 %vm2810_vm0, %v3893_v22 }
 0x2f3   :  { %2614 = vmatprep.subr.bf16.mxu0 %v3896_v31 }
 0x2f6   :  { %2616 = vmatpush3.bf16.msra.mxu0 %v3046_v62 }
 0x2f7   :  { %2617 = vmatprep.subr.bf16.mxu0 %v3896_v31 }
 0x2fa   :  { %2619 = vmatpush3.bf16.msra.mxu0 %v3066_v8 }
 0x2fb   :  { %v912_v25 = vpop.xlane.xlu1 %911  ;;  %2620 = vmatprep.subr.bf16.mxu0 %v3896_v31 }
 0x2fc   :  { %2791 = vrcp.f32 %v912_v25 }
 0x2fe   :  { %2622 = vmatpush3.bf16.msra.mxu0 %v3086_v16  ;;  %v870_v16 = vpop.permute.xlu0 %869 }
 0x2ff   :  { %2623 = vmatprep.subr.bf16.mxu0 %v3896_v31 }
 0x302   :  { %2625 = vmatpush3.bf16.msra.mxu0 %v3106_v26 }
 0x303   :  { %2626 = vmatprep.subr.bf16.mxu0 %v3896_v31 }
 0x305   :  { %v789_v55 = vpop.xlane.xlu1 %788 }
 0x306   :  { %v2792_v18 = vpop.eup %2791  ;;  %2793 = vrcp.f32 %v789_v55  ;;  %2628 = vmatpush3.bf16.msra.mxu0 %v3126_v34 }
 0x307   :  { %v934_v62 = vmul.f32 %v2792_v18, %v3639_v23  ;;  %2629 = vmatprep.subr.bf16.mxu0 %v3896_v31  ;;  %v874_v23 = vrot.slane %v870_v16, %v3616_v60 }
 0x309   :  { %2159 = vmatmul.mubr.f32.vlgmr.msra.gmra.mrb[8].mxu1 %v934_v62  ;;  %1516 = vst [vmem:[%s3867_s4 + $0x1] sm:$0x1] %v934_v62  ;;  %v792_v8 = vpop.xlane.xlu1 %791  ;;  %vm882_vm9 = vcmp.lt.s32.totalorder %v3619_v7, %v874_v23 }
 0x30a   :  { %2795 = vrcp.f32 %v792_v8  ;;  %2637 = vmatpush3.bf16.msra.mxu1 %v3024_v57  ;;  %2631 = vmatpush3.bf16.msra.mxu0 %v3146_v44  ;;  %v1538_v1 = vsel %vm882_vm9, 1.0, %v3893_v22 }
 0x30b   :  { %2638 = vmatprep.subr.bf16.mxu1 %v3896_v31  ;;  %2228 = vmatprep.mubr.msk.f32.mxu1 %vm2810_vm0, %v3893_v22 }
 0x30c   :  { %2632 = vmatprep.subr.bf16.mxu0 %v3896_v31 }
 0x30d   :  { %v863_v26 = vpop.permute.xlu1 %862 }
 0x30e   :  { %v867_v34 = vrot.slane %v863_v26, %v3616_v60  ;;  %2640 = vmatpush3.bf16.msra.mxu1 %v3048_v63  ;;  %2634 = vmatpush3.bf16.msra.mxu0 %v3166_v52 }
 0x30f   :  { %2641 = vmatprep.subr.bf16.mxu1 %v3896_v31  ;;  %2659 = vmatprep.subr.bf16.mxu0 %v3896_v31 }
 0x310   :  { %v2794_v57 = vpop.eup %2793  ;;  %vm881_vm8 = vcmp.lt.s32.totalorder %v3619_v7, %v867_v34 }
 0x311   :  { %v806_v44 = vmul.f32 %v2794_v57, %v3643_v39  ;;  %v1537_v24 = vsel %vm881_vm8, 1.0, %v3893_v22 }
 0x312   :  { %2643 = vmatpush3.bf16.msra.mxu1 %v3068_v9 }
 0x313   :  { %v3725_v63 = vmul.f32 %v1537_v24, %v806_v44  ;;  %2644 = vmatprep.subr.bf16.mxu1 %v3896_v31 }
 0x314   :  { %v2796_v52 = vpop.eup %2795 }
 0x315   :  { %v925_v60 = vsel %vm720_vm1, %v3725_v63, 0.0  ;;  %v808_v42 = vmul.f32 %v2796_v52, %v3647_v19 }
 0x316   :  { %926 = vadd.xlane.f32.xlu1 %v925_v60  ;;  %2646 = vmatpush3.bf16.msra.mxu1 %v3088_v17 }
 0x317   :  { %v3733_v39 = vmul.f32 %v1538_v1, %v808_v42  ;;  %2647 = vmatprep.subr.bf16.mxu1 %v3896_v31 }
 0x319   :  { %v928_v9 = vsel %vm720_vm1, %v3733_v39, 0.0 }
 0x31a   :  { %929 = vadd.xlane.f32.xlu1 %v928_v9  ;;  %2649 = vmatpush3.bf16.msra.mxu1 %v3108_v27 }
 0x31b   :  { %2650 = vmatprep.subr.bf16.mxu1 %v3896_v31 }
 0x31e   :  { %2652 = vmatpush3.bf16.msra.mxu1 %v3128_v35 }
 0x31f   :  { %2653 = vmatprep.subr.bf16.mxu1 %v3896_v31 }
 0x322   :  { %2655 = vmatpush3.bf16.msra.mxu1 %v3148_v45 }
 0x323   :  { %2656 = vmatprep.subr.bf16.mxu1 %v3896_v31 }
 0x326   :  { %2658 = vmatpush3.bf16.msra.mxu1 %v3168_v53 }
 0x327   :  { %2683 = vmatprep.subr.bf16.mxu1 %v3896_v31 }
 0x33a   :  { %v918_v17 = vpop.xlane.xlu0 %917 }
 0x33b   :  { %2797 = vrcp.f32 %v918_v17 }
 0x33e   :  { %v915_v7 = vpop.xlane.xlu1 %914 }
 0x33f   :  { %2799 = vrcp.f32 %v915_v7 }
 0x345   :  { %v2798_v19 = vpop.eup %2797 }
 0x346   :  { %v938_v27 = vmul.f32 %v2798_v19, %v3661_v49 }
 0x348   :  { %2229 = vmatmul.mubr.f32.vlgmr.msra.gmra.mrb[10].mxu1 %v938_v27  ;;  %1518 = vst [vmem:[%s3867_s4 + $0x3] sm:$0x1] %v938_v27 }
 0x349   :  { %v2800_v35 = vpop.eup %2799  ;;  %2685 = vmatpush3.bf16.msra.mxu1 %v3194_v2  ;;  %2298 = vmatprep.mubr.msk.f32.mxu1 %vm2810_vm0, %v3893_v22 }
 0x34a   :  { %v936_v45 = vmul.f32 %v2800_v35, %v3666_v43  ;;  %2686 = vmatprep.subr.bf16.mxu1 %v3896_v31 }
 0x34c   :  { %2194 = vmatmul.mubr.f32.vlgmr.msra.gmra.mrb[10].mxu0 %v936_v45  ;;  %1517 = vst [vmem:[%s3867_s4 + $0x2] sm:$0x1] %v936_v45 }
 0x34d   :  { %2661 = vmatpush3.bf16.msra.mxu0 %v3189_v61  ;;  %2688 = vmatpush3.bf16.msra.mxu1 %v3218_v15 }
 0x34e   :  { %2662 = vmatprep.subr.bf16.mxu0 %v3896_v31  ;;  %2689 = vmatprep.subr.bf16.mxu1 %v3896_v31 }
 0x34f   :  { %2263 = vmatprep.mubr.msk.f32.mxu0 %vm2810_vm0, %v3893_v22 }
 0x351   :  { %2664 = vmatpush3.bf16.msra.mxu0 %v3216_v14  ;;  %2691 = vmatpush3.bf16.msra.mxu1 %v3238_v29  ;;  %v3897_v29 = vld [vmem:[#allocation2_spill] sm:$0xff] }
 0x352   :  { %2665 = vmatprep.subr.bf16.mxu0 %v3896_v31  ;;  %2692 = vmatprep.subr.bf16.mxu1 %v3896_v31 }
 0x355   :  { %2667 = vmatpush3.bf16.msra.mxu0 %v3236_v28  ;;  %2694 = vmatpush3.bf16.msra.mxu1 %v3258_v41  ;;  %v3899_v41 = vld [vmem:[#allocation3_spill] sm:$0xff] }
 0x356   :  { %2668 = vmatprep.subr.bf16.mxu0 %v3896_v31  ;;  %2695 = vmatprep.subr.bf16.mxu1 %v3896_v31 }
 0x359   :  { %2670 = vmatpush3.bf16.msra.mxu0 %v3256_v40  ;;  %2697 = vmatpush3.bf16.msra.mxu1 %v3281_v59  ;;  %v3898_v40 = vld [vmem:[#allocation5_spill] sm:$0xff]  ;;  %v3901_v59 = vld [vmem:[#allocation4_spill] sm:$0xff] }
 0x35a   :  { %2671 = vmatprep.subr.bf16.mxu0 %v3896_v31  ;;  %2698 = vmatprep.subr.bf16.mxu1 %v3896_v31 }
 0x35d   :  { %2673 = vmatpush3.bf16.msra.mxu0 %v3279_v58  ;;  %2700 = vmatpush3.bf16.msra.mxu1 %v3301_v11  ;;  %v3900_v58 = vld [vmem:[#allocation7_spill] sm:$0xff]  ;;  %v3903_v11 = vld [vmem:[#allocation6_spill] sm:$0xff] }
 0x35e   :  { %2674 = vmatprep.subr.bf16.mxu0 %v3896_v31  ;;  %2701 = vmatprep.subr.bf16.mxu1 %v3896_v31 }
 0x361   :  { %2676 = vmatpush3.bf16.msra.mxu0 %v3299_v10  ;;  %2703 = vmatpush3.bf16.msra.mxu1 %v3321_v33  ;;  %v3902_v10 = vld [vmem:[#allocation9_spill] sm:$0xff]  ;;  %v3905_v33 = vld [vmem:[#allocation10_spill] sm:$0xff] }
 0x362   :  { %2677 = vmatprep.subr.bf16.mxu0 %v3896_v31  ;;  %2704 = vmatprep.subr.bf16.mxu1 %v3896_v31 }
 0x363   :  { %v921_v53 = vpop.xlane.xlu1 %920 }
 0x364   :  { %2801 = vrcp.f32 %v921_v53 }
 0x365   :  { %2679 = vmatpush3.bf16.msra.mxu0 %v3319_v32  ;;  %2706 = vmatpush3.bf16.msra.mxu1 %v3341_v51  ;;  %v3904_v32 = vld [vmem:[#allocation8_spill] sm:$0xff] }
 0x366   :  { %2680 = vmatprep.subr.bf16.mxu0 %v3896_v31  ;;  %2731 = vmatprep.subr.bf16.mxu1 %v3896_v31 }
 0x369   :  { %2682 = vmatpush3.bf16.msra.mxu0 %v3339_v50 }
 0x36a   :  { %2707 = vmatprep.subr.bf16.mxu0 %v3896_v31 }
 0x36e   :  { %v2802_v61 = vpop.eup %2801 }
 0x36f   :  { %v924_v2 = vpop.xlane.xlu1 %923  ;;  %v940_v14 = vmul.f32 %v2802_v61, %v3674_v30 }
 0x370   :  { %2803 = vrcp.f32 %v924_v2 }
 0x371   :  { %2264 = vmatmul.mubr.f32.vlgmr.msra.gmra.mrb[12].mxu0 %v940_v14  ;;  %1519 = vst [vmem:[%s3867_s4 + $0x4] sm:$0x1] %v940_v14 }
 0x372   :  { %2709 = vmatpush3.bf16.msra.mxu0 %v3362_v5  ;;  %2333 = vmatprep.mubr.msk.f32.mxu0 %vm2810_vm0, %v3893_v22 }
 0x373   :  { %2710 = vmatprep.subr.bf16.mxu0 %v3896_v31 }
 0x376   :  { %2712 = vmatpush3.bf16.msra.mxu0 %v3389_v46 }
 0x377   :  { %2713 = vmatprep.subr.bf16.mxu0 %v3896_v31 }
 0x37a   :  { %v2804_v15 = vpop.eup %2803  ;;  %2715 = vmatpush3.bf16.msra.mxu0 %v3409_v3 }
 0x37b   :  { %v942_v28 = vmul.f32 %v2804_v15, %v3682_v37  ;;  %2716 = vmatprep.subr.bf16.mxu0 %v3896_v31 }
 0x37d   :  { %2299 = vmatmul.mubr.f32.vlgmr.msra.gmra.mrb[12].mxu1 %v942_v28  ;;  %1520 = vst [vmem:[%s3867_s4 + $0x5] sm:$0x1] %v942_v28 }
 0x37e   :  { %2733 = vmatpush3.bf16.msra.mxu1 %v3367_v21  ;;  %2718 = vmatpush3.bf16.msra.mxu0 %v3429_v54 }
 0x37f   :  { %2734 = vmatprep.subr.bf16.mxu1 %v3896_v31  ;;  %2719 = vmatprep.subr.bf16.mxu0 %v3896_v31 }
 0x380   :  { %2368 = vmatprep.mubr.msk.f32.mxu1 %vm2810_vm0, %v3893_v22 }
 0x382   :  { %2736 = vmatpush3.bf16.msra.mxu1 %v3391_v47  ;;  %2721 = vmatpush3.bf16.msra.mxu0 %v3449_v38 }
 0x383   :  { %2737 = vmatprep.subr.bf16.mxu1 %v3896_v31  ;;  %2722 = vmatprep.subr.bf16.mxu0 %v3896_v31 }
 0x386   :  { %2739 = vmatpush3.bf16.msra.mxu1 %v3897_v29  ;;  %2724 = vmatpush3.bf16.msra.mxu0 %v3898_v40 }
 0x387   :  { %2740 = vmatprep.subr.bf16.mxu1 %v3896_v31  ;;  %2725 = vmatprep.subr.bf16.mxu0 %v3896_v31 }
 0x38a   :  { %2742 = vmatpush3.bf16.msra.mxu1 %v3899_v41  ;;  %2727 = vmatpush3.bf16.msra.mxu0 %v3900_v58 }
 0x38b   :  { %2743 = vmatprep.subr.bf16.mxu1 %v3896_v31  ;;  %2728 = vmatprep.subr.bf16.mxu0 %v3896_v31 }
 0x38e   :  { %2745 = vmatpush3.bf16.msra.mxu1 %v3901_v59  ;;  %2730 = vmatpush3.bf16.msra.mxu0 %v3902_v10 }
 0x38f   :  { %2746 = vmatprep.subr.bf16.mxu1 %v3896_v31 }
 0x392   :  { %2748 = vmatpush3.bf16.msra.mxu1 %v3903_v11 }
 0x393   :  { %2749 = vmatprep.subr.bf16.mxu1 %v3896_v31 }
 0x396   :  { %2751 = vmatpush3.bf16.msra.mxu1 %v3904_v32 }
 0x397   :  { %2752 = vmatprep.subr.bf16.mxu1 %v3896_v31 }
 0x39a   :  { %2754 = vmatpush3.bf16.msra.mxu1 %v3905_v33 }
 0x3a3   :  { %v927_v50 = vpop.xlane.xlu1 %926 }
 0x3a4   :  { %2805 = vrcp.f32 %v927_v50 }
 0x3a7   :  { %v930_v51 = vpop.xlane.xlu1 %929 }
 0x3a8   :  { %2807 = vrcp.f32 %v930_v51 }
 0x3ae   :  { %v2806_v5 = vpop.eup %2805 }
 0x3af   :  { %v944_v21 = vmul.f32 %v2806_v5, %v3725_v63 }
 0x3b1   :  { %2334 = vmatmul.mubr.f32.vlgmr.msra.gmra.mrb[14].mxu0 %v944_v21  ;;  %1521 = vst [vmem:[%s3867_s4 + $0x6] sm:$0x1] %v944_v21 }
 0x3b2   :  { %v2808_v46 = vpop.eup %2807 }
 0x3b3   :  { %v946_v47 = vmul.f32 %v2808_v46, %v3733_v39 }
 0x3b5   :  { %2369 = vmatmul.mubr.f32.vlgmr.msra.gmra.mrb[14].mxu1 %v946_v47  ;;  %1522 = vst [vmem:[%s3867_s4 + $0x7] sm:$0x1] %v946_v47 }
 0x3c4   :  { %v1013_v3 = vpop.f32.mrb[8].mxu0 }
 0x3c5   :  { %1507 = vst [vmem:[%s3868_s3] sm:$0x1] %v1013_v3  ;;  %v2125_v54 = vpop.f32.mrb[9].mxu0 }
 0x3dc   :  { %v1083_v38 = vpop.f32.mrb[8].mxu1 }
 0x3dd   :  { %1508 = vst [vmem:[%s3868_s3 + $0x1] sm:$0x1] %v1083_v38  ;;  %v2160_v22 = vpop.f32.mrb[9].mxu1 }
 0x41b   :  { %v1223_v49 = vpop.f32.mrb[10].mxu1 }
 0x41c   :  { %1510 = vst [vmem:[%s3868_s3 + $0x3] sm:$0x1] %v1223_v49  ;;  %v2230_v43 = vpop.f32.mrb[11].mxu1 }
 0x41f   :  { %v1153_v30 = vpop.f32.mrb[10].mxu0 }
 0x420   :  { %1509 = vst [vmem:[%s3868_s3 + $0x2] sm:$0x1] %v1153_v30  ;;  %v2195_v20 = vpop.f32.mrb[11].mxu0 }
 0x444   :  { %v1293_v12 = vpop.f32.mrb[12].mxu0 }
 0x445   :  { %1511 = vst [vmem:[%s3868_s3 + $0x4] sm:$0x1] %v1293_v12  ;;  %v2265_v4 = vpop.f32.mrb[13].mxu0 }
 0x450   :  { %v1363_v56 = vpop.f32.mrb[12].mxu1 }
 0x451   :  { %1512 = vst [vmem:[%s3868_s3 + $0x5] sm:$0x1] %v1363_v56  ;;  %v2300_v6 = vpop.f32.mrb[13].mxu1 }
 0x484   :  { %v1433_v37 = vpop.f32.mrb[14].mxu0 }
 0x485   :  { %1513 = vst [vmem:[%s3868_s3 + $0x6] sm:$0x1] %v1433_v37  ;;  %v2335_v36 = vpop.f32.mrb[15].mxu0 }
 0x488   :  { %v1503_v13 = vpop.f32.mrb[14].mxu1 }
 0x489   :  { %1514 = vst [vmem:[%s3868_s3 + $0x7] sm:$0x1] %v1503_v13  ;;  %v2370_v48 = vpop.f32.mrb[15].mxu1 }

</bundles_post_ra>
